<compile_context>
chip_gen: v6e
topology: v6e:2x2x1
jax: 0.10.0
libtpu: 0.0.40
codegen_flags: <defaults>
</compile_context>

<pallas_src>
import functools

import jax
import jax.numpy as jnp
from jax.experimental import pallas as pl
from jax.experimental.pallas import tpu as pltpu


def _round_up(a, m):
    return (a + m - 1) // m * m


# ---------------------------------------------------------------------------
# Pass 1: tiled, megacore-splittable segment-sum pool -> partials [NC, B, D]
# ---------------------------------------------------------------------------
def _pool_kernel(offs_ref, x_ref, part_ref, *, nt_inner, tile_n, num_graphs,
                 exact_small_b):
    c = pl.program_id(0)          # chunk (parallel; one per TensorCore on v7x)
    t = pl.program_id(1)          # node tile within the chunk (reduction axis)

    @pl.when(t == 0)
    def _init():
        part_ref[...] = jnp.zeros_like(part_ref)

    row0 = (c * nt_inner + t) * tile_n
    xf = x_ref[...].astype(jnp.float32)                      # [TN, D]

    # TODO(synk): for very large B these unrolled Python loops over graphs
    # should switch back to a streamed per-node id vector.
    if exact_small_b:
        # Exact f32 path: per-graph masked sublane reductions (VPU + XLU),
        # fully hidden under the x-tile DMA for small B.
        ridx = row0 + jax.lax.broadcasted_iota(jnp.int32, (tile_n, 1), 0)
        parts = []
        for g in range(num_graphs):
            m = (ridx >= offs_ref[g]) & (ridx < offs_ref[g + 1])
            parts.append(jnp.sum(jnp.where(m, xf, 0.0), axis=0, keepdims=True))
        tile_sum = jnp.concatenate(parts, axis=0)             # [B, D]
    else:
        # Large-B fallback: transpose-free one-hot MXU matmul.  The one-hot is
        # exact in bf16; x is split hi/lo so the pooled sum stays ~f32 exact.
        nidx = row0 + jax.lax.broadcasted_iota(jnp.int32, (1, tile_n), 1)
        seg = jnp.zeros((1, tile_n), jnp.int32)
        for g in range(num_graphs):
            seg = seg + (nidx >= offs_ref[g + 1]).astype(jnp.int32)
        gid = jax.lax.broadcasted_iota(jnp.int32, (num_graphs, tile_n), 0)
        onehot = (gid == seg).astype(jnp.bfloat16)            # [B, TN]
        x_hi = xf.astype(jnp.bfloat16)
        x_lo = (xf - x_hi.astype(jnp.float32)).astype(jnp.bfloat16)
        tile_sum = (
            jnp.dot(onehot, x_hi, preferred_element_type=jnp.float32)
            + jnp.dot(onehot, x_lo, preferred_element_type=jnp.float32))

    part_ref[...] += tile_sum[None, :, :]


# ---------------------------------------------------------------------------
# Pass 2: streamed x_new = x + vn_new[batch]
# ---------------------------------------------------------------------------
def _gather_add_kernel(offs_ref, x_ref, vn_ref, out_ref, *, tile_n,
                       num_graphs, select_small_b):
    t = pl.program_id(0)
    row0 = t * tile_n
    ridx = row0 + jax.lax.broadcasted_iota(jnp.int32, (tile_n, 1), 0)
    xf = x_ref[...].astype(jnp.float32)                       # [TN, D]
    d = vn_ref.shape[1]

    if select_small_b:
        # Exact f32 select chain: B-1 VPU selects, no MXU, no bf16 rounding.
        gathered = jnp.broadcast_to(vn_ref[0:1, :], (tile_n, d))
        for g in range(1, num_graphs):
            gathered = jnp.where(ridx >= offs_ref[g], vn_ref[g:g + 1, :],
                                 gathered)
    else:
        # Large-B fallback: one-hot gather matmul; vn_new is split hi/lo so
        # the gather is exact (no bf16 rounding leaks into x_new).
        seg = jnp.zeros((tile_n, 1), jnp.int32)
        for g in range(num_graphs):
            seg = seg + (ridx >= offs_ref[g + 1]).astype(jnp.int32)
        gid = jax.lax.broadcasted_iota(jnp.int32, (tile_n, num_graphs), 1)
        onehot = (seg == gid).astype(jnp.bfloat16)            # [TN, B]
        vn_f = vn_ref[...].astype(jnp.float32)
        vn_hi = vn_f.astype(jnp.bfloat16)
        vn_lo = (vn_f - vn_hi.astype(jnp.float32)).astype(jnp.bfloat16)
        gathered = (
            jnp.dot(onehot, vn_hi, preferred_element_type=jnp.float32)
            + jnp.dot(onehot, vn_lo, preferred_element_type=jnp.float32))

    # Rows past the real node count may pick up the last graph's row; they are
    # padding and are sliced off in the wrapper.
    out_ref[...] = (xf + gathered).astype(out_ref.dtype)


# ---------------------------------------------------------------------------
# Wrapper
# ---------------------------------------------------------------------------
def vn_update(vn, x, batch, w1, b1, w2, b2, num_graphs=None, *,
              tile_n=None, num_chunks=2, pool_exact_max_b=8,
              gather_select_max_b=16):
    """vn may be None (treated as zeros, like the PyTorch module).

    Assumes PyG-style contiguous `batch` (nodes of graph g are consecutive),
    which is exactly what IDPPGN.num2batch produces.
    """
    N, D = x.shape
    if vn is None:
        assert num_graphs is not None
        vn = jnp.zeros((num_graphs, D), jnp.float32)
    B = vn.shape[0]

    # Stream x in its native dtype when it is already f32/bf16 (no extra HBM
    # round trip for an astype in the wrapper).
    if x.dtype == jnp.float32 or x.dtype == jnp.bfloat16:
        x_s = x
    else:
        x_s = x.astype(jnp.float32)
    itemsize = jnp.dtype(x_s.dtype).itemsize

    # CSR-style per-graph row offsets (scalar-prefetched into SMEM) replace the
    # streamed per-node id vector entirely.
    counts = jnp.bincount(batch.astype(jnp.int32), length=B)
    offsets = jnp.concatenate(
        [jnp.zeros((1,), jnp.int32), jnp.cumsum(counts).astype(jnp.int32)])

    # Node tile: aim for ~2 MiB per streamed x block (DMA >> the ~0.35 us
    # per-grid-step overhead), clamped so pass-2's double-buffered in+out
    # blocks stay under ~12 MiB (safe for v5e's ~16 MiB scoped-VMEM default;
    # v6e/v7x defaults are 32 MiB, v7x physical VMEM is 64 MiB).
    if tile_n is None:
        tn_target = _round_up(max(-(-(2 << 20) // (D * itemsize)), 128), 128)
        tn_cap = max(128, ((12 << 20) // (4 * D * itemsize)) // 128 * 128)
        tile_n = min(tn_target, tn_cap)
    else:
        tile_n = _round_up(max(int(tile_n), 128), 128)
    tn = min(tile_n, _round_up(N, 128))

    # Grid: (num_chunks, tiles-per-chunk).  The outer axis is 'parallel' so the
    # pass-1 reduction is split across both v7x TensorCores; pad N so every
    # chunk has the same number of full tiles (padded rows fall outside
    # offsets[-1] and contribute nothing).
    nc = max(1, int(num_chunks))
    nt_natural = -(-N // tn)
    nt_inner = -(-nt_natural // nc)
    nt = nc * nt_inner
    n_pad = nt * tn
    if n_pad != N:
        x_s = jnp.pad(x_s, ((0, n_pad - N), (0, 0)))

    vn32 = vn.astype(jnp.float32)

    # -------- pass 1: megacore-split segment-sum -> per-chunk partials -------
    partials = pl.pallas_call(
        functools.partial(_pool_kernel, nt_inner=nt_inner, tile_n=tn,
                          num_graphs=B,
                          exact_small_b=(B <= pool_exact_max_b)),
        out_shape=jax.ShapeDtypeStruct((nc, B, D), jnp.float32),
        grid_spec=pltpu.PrefetchScalarGridSpec(
            num_scalar_prefetch=1,
            grid=(nc, nt_inner),
            in_specs=[pl.BlockSpec((tn, D),
                                   lambda c, t, offs: (c * nt_inner + t, 0))],
            out_specs=pl.BlockSpec((1, B, D), lambda c, t, offs: (c, 0, 0)),
        ),
        compiler_params=pltpu.CompilerParams(
            dimension_semantics=("parallel", "arbitrary")),
        cost_estimate=pl.CostEstimate(
            flops=2 * B * n_pad * D, transcendentals=0,
            bytes_accessed=n_pad * D * itemsize + nc * B * D * 4),
    )(offsets, x_s)

    # -------- tiny 2-layer MLP on the pooled [B, D], off the streaming path --
    pooled = jnp.sum(partials, axis=0) + vn32
    h = jax.nn.relu(pooled @ w1.astype(jnp.float32) + b1.astype(jnp.float32))
    vn_new = jax.nn.relu(h @ w2.astype(jnp.float32) + b2.astype(jnp.float32))

    # -------- pass 2: streamed x_new = x + vn_new[batch] ---------------------
    x_new = pl.pallas_call(
        functools.partial(_gather_add_kernel, tile_n=tn, num_graphs=B,
                          select_small_b=(B <= gather_select_max_b)),
        out_shape=jax.ShapeDtypeStruct((n_pad, D), x_s.dtype),
        grid_spec=pltpu.PrefetchScalarGridSpec(
            num_scalar_prefetch=1,
            grid=(nt,),
            in_specs=[pl.BlockSpec((tn, D), lambda t, offs: (t, 0)),
                      pl.BlockSpec((B, D), lambda t, offs: (0, 0))],
            out_specs=pl.BlockSpec((tn, D), lambda t, offs: (t, 0)),
        ),
        compiler_params=pltpu.CompilerParams(
            dimension_semantics=("parallel",)),
        cost_estimate=pl.CostEstimate(
            flops=2 * B * n_pad * D, transcendentals=0,
            bytes_accessed=2 * n_pad * D * itemsize + B * D * 4),
    )(offsets, x_s, vn_new)

    if n_pad != N:
        x_new = x_new[:N]
    return vn_new, x_new


# ---------------------------------------------------------------------------
# Plain-JAX reference mirroring the PyTorch forward.
# ---------------------------------------------------------------------------
def vn_update_ref(vn, x, batch, w1, b1, w2, b2):
    B = vn.shape[0]
    G = jax.ops.segment_sum(x.astype(jnp.float32), batch, num_segments=B)
    G = G + vn
    h = jax.nn.relu(G @ w1 + b1)
    vn_new = jax.nn.relu(h @ w2 + b2)
    x_new = x + vn_new[batch]
    return vn_new, x_new


if __name__ == "__main__":
    D = 128   # feature dim (lane-dense blocks)
    N = 300   # nodes (not a tile multiple -> exercises padding / tail tiles)
    B = 3     # graphs in the batch (exact small-B pool + gather paths)

    key = jax.random.PRNGKey(0)
    k_x, k_vn, k_w1, k_b1, k_w2, k_b2 = jax.random.split(key, 6)

    x = jax.random.normal(k_x, (N, D), dtype=jnp.float32)
    vn = jax.random.normal(k_vn, (B, D), dtype=jnp.float32)
    # PyG-style contiguous batch (what IDPPGN.num2batch produces).
    counts = jnp.asarray([120, 97, 83], dtype=jnp.int32)      # sums to N
    batch = jnp.repeat(jnp.arange(B, dtype=jnp.int32), counts,
                       total_repeat_length=N)

    scale = 1.0 / jnp.sqrt(jnp.float32(D))
    w1 = jax.random.uniform(k_w1, (D, D), jnp.float32, -scale, scale)
    b1 = jax.random.uniform(k_b1, (D,), jnp.float32, -scale, scale)
    w2 = jax.random.uniform(k_w2, (D, D), jnp.float32, -scale, scale)
    b2 = jax.random.uniform(k_b2, (D,), jnp.float32, -scale, scale)

    vn_r, x_r = vn_update_ref(vn, x, batch, w1, b1, w2, b2)

    # Small tile (128) -> multiple node tiles per chunk: exercises multi-tile
    # accumulation into the resident [1, B, D] block, the 2-chunk megacore
    # grid, tail padding and the streamed gather pass.
    run_small = jax.jit(functools.partial(vn_update, tile_n=128))
    vn_new, x_new = run_small(vn, x, batch, w1, b1, w2, b2)
    jax.block_until_ready((vn_new, x_new))
    assert jnp.allclose(vn_new, vn_r, atol=3e-4, rtol=1e-4), "vn_new mismatch"
    assert jnp.allclose(x_new, x_r, atol=3e-4, rtol=1e-4), "x_new mismatch"

    # Auto-derived tile (~2 MiB target, clamped to the array): one tile per
    # chunk, the second chunk is pure padding -> exercises that config too.
    run_auto = jax.jit(vn_update)
    vn_new2, x_new2 = run_auto(vn, x, batch, w1, b1, w2, b2)
    jax.block_until_ready((vn_new2, x_new2))
    assert jnp.allclose(vn_new2, vn_r, atol=3e-4, rtol=1e-4), "vn_new mismatch"
    assert jnp.allclose(x_new2, x_r, atol=3e-4, rtol=1e-4), "x_new mismatch"

    print("KERNEL_OK")
</pallas_src>

<mosaic_0001>
module attributes {stable_mosaic.version = 11 : i64} {
  func.func @_pool_kernel(%arg0: i32, %arg1: i32, %arg2: memref<4xi32, #tpu.memory_space<smem>>, %arg3: memref<128x128xf32, #tpu.memory_space<vmem>>, %arg4: memref<1x3x128xf32, #tpu.memory_space<vmem>>) attributes {dimension_semantics = [#tpu.dimension_semantics<parallel>, #tpu.dimension_semantics<arbitrary>], iteration_bounds = array<i64: 2, 2>, scalar_prefetch = 1 : i64, scratch_operands = 0 : i64, tpu.core_type = #tpu.core_type<tc>, window_params = [{transform_indices = @transform_0, window_bounds = array<i64: 128, 128>}, {transform_indices = @transform_1, window_bounds = array<i64: 1, 3, 128>}]} {
    %c0_i32 = arith.constant 0 : i32
    %0 = arith.cmpi eq, %arg1, %c0_i32 : i32
    %1 = arith.extui %0 : i1 to i32
    %c0_i32_0 = arith.constant 0 : i32
    %2 = arith.cmpi ne, %1, %c0_i32_0 : i32
    scf.if %2 {
      %cst_16 = arith.constant 0.000000e+00 : f32
      %54 = vector.broadcast %cst_16 : f32 to vector<1x3x128xf32>
      %c0_17 = arith.constant 0 : index
      %c0_18 = arith.constant 0 : index
      %c0_19 = arith.constant 0 : index
      %55 = vector.load %arg4[%c0_17, %c0_18, %c0_19] : memref<1x3x128xf32, #tpu.memory_space<vmem>>, vector<1x3x128xf32>
      tpu.vector_store %arg4[%c0_17, %c0_18, %c0_19], %54 {strides = array<i32>} : memref<1x3x128xf32, #tpu.memory_space<vmem>>, vector<1x3x128xf32>,
    } else {
    }
    %c2_i32 = arith.constant 2 : i32
    %3 = arith.muli %arg0, %c2_i32 : i32
    %4 = arith.addi %3, %arg1 : i32
    %c128_i32 = arith.constant 128 : i32
    %5 = arith.muli %4, %c128_i32 : i32
    %c0 = arith.constant 0 : index
    %c0_1 = arith.constant 0 : index
    %6 = vector.load %arg3[%c0, %c0_1] : memref<128x128xf32, #tpu.memory_space<vmem>>, vector<128x128xf32>
    %7 = tpu.iota {dimensions = array<i32: 0>} : vector<128x1xi32>
    %8 = vector.broadcast %5 : i32 to vector<128x1xi32>
    %9 = arith.addi %8, %7 : vector<128x1xi32>
    %c0_2 = arith.constant 0 : index
    %10 = memref.load %arg2[%c0_2] : memref<4xi32, #tpu.memory_space<smem>>
    %11 = vector.broadcast %10 : i32 to vector<128x1xi32>
    %12 = arith.cmpi sge, %9, %11 : vector<128x1xi32>
    %c1 = arith.constant 1 : index
    %13 = memref.load %arg2[%c1] : memref<4xi32, #tpu.memory_space<smem>>
    %14 = vector.broadcast %13 : i32 to vector<128x1xi32>
    %15 = arith.cmpi slt, %9, %14 : vector<128x1xi32>
    %16 = arith.andi %12, %15 : vector<128x1xi1>
    %cst = arith.constant 0.000000e+00 : f32
    %17 = vector.shape_cast %16 : vector<128x1xi1> to vector<128x1xi1>
    %18 = vector.broadcast %17 : vector<128x1xi1> to vector<128x128xi1>
    %19 = vector.broadcast %cst : f32 to vector<128x128xf32>
    %20 = arith.select %18, %6, %19 : vector<128x128xi1>, vector<128x128xf32>
    %cst_3 = arith.constant dense<0.000000e+00> : vector<128xf32>
    %21 = vector.multi_reduction <add>, %20, %cst_3 [0] : vector<128x128xf32> to vector<128xf32>
    %22 = vector.shape_cast %21 : vector<128xf32> to vector<1x128xf32>
    %c1_4 = arith.constant 1 : index
    %23 = memref.load %arg2[%c1_4] : memref<4xi32, #tpu.memory_space<smem>>
    %24 = vector.broadcast %23 : i32 to vector<128x1xi32>
    %25 = arith.cmpi sge, %9, %24 : vector<128x1xi32>
    %c2 = arith.constant 2 : index
    %26 = memref.load %arg2[%c2] : memref<4xi32, #tpu.memory_space<smem>>
    %27 = vector.broadcast %26 : i32 to vector<128x1xi32>
    %28 = arith.cmpi slt, %9, %27 : vector<128x1xi32>
    %29 = arith.andi %25, %28 : vector<128x1xi1>
    %cst_5 = arith.constant 0.000000e+00 : f32
    %30 = vector.shape_cast %29 : vector<128x1xi1> to vector<128x1xi1>
    %31 = vector.broadcast %30 : vector<128x1xi1> to vector<128x128xi1>
    %32 = vector.broadcast %cst_5 : f32 to vector<128x128xf32>
    %33 = arith.select %31, %6, %32 : vector<128x128xi1>, vector<128x128xf32>
    %cst_6 = arith.constant dense<0.000000e+00> : vector<128xf32>
    %34 = vector.multi_reduction <add>, %33, %cst_6 [0] : vector<128x128xf32> to vector<128xf32>
    %35 = vector.shape_cast %34 : vector<128xf32> to vector<1x128xf32>
    %c2_7 = arith.constant 2 : index
    %36 = memref.load %arg2[%c2_7] : memref<4xi32, #tpu.memory_space<smem>>
    %37 = vector.broadcast %36 : i32 to vector<128x1xi32>
    %38 = arith.cmpi sge, %9, %37 : vector<128x1xi32>
    %c3 = arith.constant 3 : index
    %39 = memref.load %arg2[%c3] : memref<4xi32, #tpu.memory_space<smem>>
    %40 = vector.broadcast %39 : i32 to vector<128x1xi32>
    %41 = arith.cmpi slt, %9, %40 : vector<128x1xi32>
    %42 = arith.andi %38, %41 : vector<128x1xi1>
    %cst_8 = arith.constant 0.000000e+00 : f32
    %43 = vector.shape_cast %42 : vector<128x1xi1> to vector<128x1xi1>
    %44 = vector.broadcast %43 : vector<128x1xi1> to vector<128x128xi1>
    %45 = vector.broadcast %cst_8 : f32 to vector<128x128xf32>
    %46 = arith.select %44, %6, %45 : vector<128x128xi1>, vector<128x128xf32>
    %cst_9 = arith.constant dense<0.000000e+00> : vector<128xf32>
    %47 = vector.multi_reduction <add>, %46, %cst_9 [0] : vector<128x128xf32> to vector<128xf32>
    %48 = vector.shape_cast %47 : vector<128xf32> to vector<1x128xf32>
    %49 = tpu.concatenate %22, %35, %48 in 0 : vector<1x128xf32>, vector<1x128xf32>, vector<1x128xf32> -> vector<3x128xf32>
    %c0_10 = arith.constant 0 : index
    %c0_11 = arith.constant 0 : index
    %c0_12 = arith.constant 0 : index
    %50 = vector.load %arg4[%c0_10, %c0_11, %c0_12] : memref<1x3x128xf32, #tpu.memory_space<vmem>>, vector<1x3x128xf32>
    %51 = vector.shape_cast %49 : vector<3x128xf32> to vector<1x3x128xf32>
    %52 = arith.addf %50, %51 : vector<1x3x128xf32>
    %c0_13 = arith.constant 0 : index
    %c0_14 = arith.constant 0 : index
    %c0_15 = arith.constant 0 : index
    %53 = vector.load %arg4[%c0_13, %c0_14, %c0_15] : memref<1x3x128xf32, #tpu.memory_space<vmem>>, vector<1x3x128xf32>
    tpu.vector_store %arg4[%c0_13, %c0_14, %c0_15], %52 {strides = array<i32>} : memref<1x3x128xf32, #tpu.memory_space<vmem>>, vector<1x3x128xf32>,
    return
  }
  func.func @transform_0(%arg0: i32, %arg1: i32, %arg2: memref<4xi32, #tpu.memory_space<smem>>) -> (i32, i32) {
    %c2_i32 = arith.constant 2 : i32
    %0 = arith.muli %arg0, %c2_i32 : i32
    %1 = arith.addi %0, %arg1 : i32
    %c0_i32 = arith.constant 0 : i32
    %c0_i32_0 = arith.constant 0 : i32
    return %1, %c0_i32 : i32, i32
  }
  func.func @transform_1(%arg0: i32, %arg1: i32, %arg2: memref<4xi32, #tpu.memory_space<smem>>) -> (i32, i32, i32) {
    %c0_i32 = arith.constant 0 : i32
    %c0_i32_0 = arith.constant 0 : i32
    %c0_i32_1 = arith.constant 0 : i32
    return %arg0, %c0_i32, %c0_i32_0 : i32, i32, i32
  }
}

module attributes {stable_mosaic.version = 11 : i64} {
  func.func @_gather_add_kernel(%arg0: i32, %arg1: memref<4xi32, #tpu.memory_space<smem>>, %arg2: memref<128x128xf32, #tpu.memory_space<vmem>>, %arg3: memref<3x128xf32, #tpu.memory_space<vmem>>, %arg4: memref<128x128xf32, #tpu.memory_space<vmem>>) attributes {dimension_semantics = [#tpu.dimension_semantics<parallel>], iteration_bounds = array<i64: 4>, scalar_prefetch = 1 : i64, scratch_operands = 0 : i64, tpu.core_type = #tpu.core_type<tc>, window_params = [{transform_indices = @transform_0, window_bounds = array<i64: 128, 128>}, {pipeline_mode = #tpu.pipeline_mode<synchronous>, transform_indices = @transform_1, window_bounds = array<i64: 3, 128>}, {transform_indices = @transform_2, window_bounds = array<i64: 128, 128>}]} {
    %c128_i32 = arith.constant 128 : i32
    %0 = arith.muli %arg0, %c128_i32 : i32
    %1 = tpu.iota {dimensions = array<i32: 0>} : vector<128x1xi32>
    %2 = vector.broadcast %0 : i32 to vector<128x1xi32>
    %3 = arith.addi %2, %1 : vector<128x1xi32>
    %c0 = arith.constant 0 : index
    %c0_0 = arith.constant 0 : index
    %4 = vector.load %arg2[%c0, %c0_0] : memref<128x128xf32, #tpu.memory_space<vmem>>, vector<128x128xf32>
    %c0_1 = arith.constant 0 : index
    %c0_2 = arith.constant 0 : index
    %5 = vector.load %arg3[%c0_1, %c0_2] : memref<3x128xf32, #tpu.memory_space<vmem>>, vector<1x128xf32>
    %6 = vector.shape_cast %5 : vector<1x128xf32> to vector<1x128xf32>
    %7 = vector.broadcast %6 : vector<1x128xf32> to vector<128x128xf32>
    %c1 = arith.constant 1 : index
    %8 = memref.load %arg1[%c1] : memref<4xi32, #tpu.memory_space<smem>>
    %9 = vector.broadcast %8 : i32 to vector<128x1xi32>
    %10 = arith.cmpi sge, %3, %9 : vector<128x1xi32>
    %c1_3 = arith.constant 1 : index
    %c0_4 = arith.constant 0 : index
    %11 = vector.load %arg3[%c1_3, %c0_4] : memref<3x128xf32, #tpu.memory_space<vmem>>, vector<1x128xf32>
    %12 = vector.shape_cast %10 : vector<128x1xi1> to vector<128x1xi1>
    %13 = vector.broadcast %12 : vector<128x1xi1> to vector<128x128xi1>
    %14 = vector.shape_cast %11 : vector<1x128xf32> to vector<1x128xf32>
    %15 = vector.broadcast %14 : vector<1x128xf32> to vector<128x128xf32>
    %16 = arith.select %13, %15, %7 : vector<128x128xi1>, vector<128x128xf32>
    %c2 = arith.constant 2 : index
    %17 = memref.load %arg1[%c2] : memref<4xi32, #tpu.memory_space<smem>>
    %18 = vector.broadcast %17 : i32 to vector<128x1xi32>
    %19 = arith.cmpi sge, %3, %18 : vector<128x1xi32>
    %c2_5 = arith.constant 2 : index
    %c0_6 = arith.constant 0 : index
    %20 = vector.load %arg3[%c2_5, %c0_6] : memref<3x128xf32, #tpu.memory_space<vmem>>, vector<1x128xf32>
    %21 = vector.shape_cast %19 : vector<128x1xi1> to vector<128x1xi1>
    %22 = vector.broadcast %21 : vector<128x1xi1> to vector<128x128xi1>
    %23 = vector.shape_cast %20 : vector<1x128xf32> to vector<1x128xf32>
    %24 = vector.broadcast %23 : vector<1x128xf32> to vector<128x128xf32>
    %25 = arith.select %22, %24, %16 : vector<128x128xi1>, vector<128x128xf32>
    %26 = arith.addf %4, %25 : vector<128x128xf32>
    %c0_7 = arith.constant 0 : index
    %c0_8 = arith.constant 0 : index
    %27 = vector.load %arg4[%c0_7, %c0_8] : memref<128x128xf32, #tpu.memory_space<vmem>>, vector<128x128xf32>
    tpu.vector_store %arg4[%c0_7, %c0_8], %26 {strides = array<i32>} : memref<128x128xf32, #tpu.memory_space<vmem>>, vector<128x128xf32>,
    return
  }
  func.func @transform_0(%arg0: i32, %arg1: memref<4xi32, #tpu.memory_space<smem>>) -> (i32, i32) {
    %c0_i32 = arith.constant 0 : i32
    %c0_i32_0 = arith.constant 0 : i32
    return %arg0, %c0_i32 : i32, i32
  }
  func.func @transform_1(%arg0: i32, %arg1: memref<4xi32, #tpu.memory_space<smem>>) -> (i32, i32) {
    %c0_i32 = arith.constant 0 : i32
    %c0_i32_0 = arith.constant 0 : i32
    %c0_i32_1 = arith.constant 0 : i32
    return %c0_i32, %c0_i32_0 : i32, i32
  }
  func.func @transform_2(%arg0: i32, %arg1: memref<4xi32, #tpu.memory_space<smem>>) -> (i32, i32) {
    %c0_i32 = arith.constant 0 : i32
    %c0_i32_0 = arith.constant 0 : i32
    return %arg0, %c0_i32 : i32, i32
  }
}

</mosaic_0001>

<bundles_post_ra>
// kernel: vn_update.2
= control target key start
LH: loop header
LB: loop body
LE: loop exit
PB: predicated region body
PF: predicated region fallthrough
CT: control target
= control target key end

     0   :  { %s1657_s0 = inlined_call_operand.vmem [shape: s32[4], index: 0, kind: input, shape index: {}]   ;;  %s1658_s1 = inlined_call_operand.vmem [shape: f32[512,128], index: 1, kind: input, shape index: {}]   ;;  %s1659_s2 = inlined_call_operand.vmem [shape: f32[2,3,128], index: 2, kind: output, shape index: {}]  }
   0x1   :  { %s7_s11 = sshll.u32 %s1657_s0, 4  ;;  %s8_s11 = int_to_ptr.vmem [resolvable:$true] %s7_s11 }
   0x2   :  { %s699_s12 = scalar_lea.vmem %s8_s11, 16  ;;  %p704_p1 = scmp.lt.s32.totalorder %s8_s11, %s8_s11 }
   0x3   :  { %p700_p0 = scmp.ne.s32.totalorder %s8_s11, %s699_s12  ;;  %p705_p2 = scmp.lt.s32.totalorder %s699_s12, %s699_s12 }
   0x5   :  { %p706_p3 = por %p705_p2, %p704_p1 }
   0x7   :  { %p707_p4 = pnand %p706_p3, %p700_p0 }
   0x9   :  { %710 = shalt.err (!%p707_p4)  }
   0xa   :  { %s753_s13 = smov [#allocation3]  }
   0xb   :  { %10 = dma.vmem_to_smem %s8_s11, 16, %s753_s13, [#allocation2] }
   0xc   :  { %731 = dma.done.wait [#allocation2], 16 }
   0xd   :  { %732 = vsyncadd [#allocation2], 4294967280 }
   0xe   :  { %12 = sfence }
   0xf   :  { %s773_s14 = smov 0   ;;  %s775_s15 = smov 0  }
  0x10   :  { %s777_s16 = smov 0   ;;  %s779_s0 = smov 0  }
  0x11   :  { %s781_s17 = smov 0  }
  0x12 LB: > { %s27_s18 = sadd.s32 1, %s743_s16  ;;  %s30_s19 = sadd.s32 1, %s747_s0  ;;  %s751_s17 = sphi %s781_s17, %s18_s17   ;;  %s747_s0 = sphi %s779_s0, %s1759_s0   ;;  %s743_s16 = sphi %s777_s16, %s1758_s16   ;;  %s739_s15 = sphi %s775_s15, %s1757_s15   ;;  %s735_s14 = sphi %s773_s14, %s1756_s14  }
  0x13   : > { %p28_p5 = scmp.ge.s32.totalorder %s27_s18, 2  ;;  %p644_p6 = scmp.ge.s32.totalorder %s751_s17, 1 }
  0x14   : > { %p115_p7 = scmp.lt.s32.totalorder %s751_s17, 5 }
  0x15   : > { %s1761_s18 = smov (%p28_p5, %s27_s18), 0  ;;  %s1763_s19 = smov (!%p28_p5, %s30_s19), %s747_s0 }
  0x16   : > { %p116_p8 = pnand %p644_p6, %p115_p7  ;;  %p32_p9 = scmp.ge.s32.totalorder %s1763_s19, 2 }
  0x17   : > { %s645_s20 = sshll.u32 (!%p116_p8), %s739_s15, 1  ;;  %p146_p10 = scmp.lt.s32.totalorder (!%p116_p8), %s739_s15, 1 }
  0x18   : > { %s1765_s19 = smov (%p32_p9, %s1763_s19), 0  ;;  %119 = sbr.rel (%p116_p8) target bundleno = 129 (0x81), region = 24 }
  0x19   : > { %s137_s21 = sadd.s32 (!%p116_p8), %s735_s14, %s645_s20  ;;  %p649_p12 = scmp.ne.s32.totalorder (!%p116_p8), %s735_s14, 0 }
  0x1a   : > { %s646_s22 = sshll.u32 (!%p116_p8), %s137_s21, 4 }
  0x1b   : > { %p139_p11 = scmp.lt.s32.totalorder (!%p116_p8), %s646_s22, 63 }
  0x1d   : > { %s1767_s15 = smov (!%p146_p10, %s739_s15), 1  ;;  %s1769_s22 = smov (!%p139_p11, %s646_s22), 63 }
  0x1e   : > { %s648_s23 = sshll.u32 %s1767_s15, 2  ;;  %s647_s24 = sshll.u32 %s1769_s22, 3 }
  0x1f   : > { %s806_s27 = scalar_lea.vmem %s1659_s2, %s648_s23  ;;  %s811_s30 = scalar_lea.vmem %s1658_s1, %s647_s24 }
  0x20   : > { %153 = sbr.rel (%p649_p12) target bundleno = 39 (0x27), region = 28 }
  0x25   : > { %v754_v0 = vmov 0.0  }
  0x26   : > { %154 = vst [vmem:[%s806_s27] sm:$0x7] %v754_v0 }
  0x27 PF: > { %v174_v1 = vlaneseq  ;;  %s208_s3 = sld [smem:[#allocation3]]  ;;  %s651_s4 = sshll.u32 %s137_s21, 7  ;;  %v853_v19 = vld [vmem:[%s811_s30] sm:$0xff]  ;;  %v864_v20 = vld [vmem:[%s811_s30 + $0x8] sm:$0xff]  ;;  %v867_v21 = vld [vmem:[%s811_s30 + $0x10] sm:$0xff] }
  0x28   : > { %v817_v4 = vstv %s651_s4  ;;  %s652_s5 = sld [smem:[#allocation3 + $0x1]]  ;;  %v893_v26 = vld [vmem:[%s811_s30 + $0x18] sm:$0xff]  ;;  %v932_v34 = vld [vmem:[%s811_s30 + $0x20] sm:$0xff]  ;;  %v957_v41 = vld [vmem:[%s811_s30 + $0x28] sm:$0xff] }
  0x29   : > { %v814_v2 = vshrl.u32 %v174_v1, 7  ;;  %s911_s6 = sld [smem:[#allocation3 + $0x2]]  ;;  %v982_v48 = vld [vmem:[%s811_s30 + $0x30] sm:$0xff]  ;;  %v1006_v55 = vld [vmem:[%s811_s30 + $0x38] sm:$0xff]  ;;  %v1033_v63 = vld [vmem:[%s811_s30 + $0x40] sm:$0xff] }
  0x2a   : > { %s1060_s7 = sld [smem:[#allocation3 + $0x3]] }
  0x2b   : > { %v176_v3 = vadd.s32 8, %v814_v2  ;;  %v177_v5 = vadd.s32 16, %v814_v2  ;;  %v178_v6 = vadd.s32 24, %v814_v2  ;;  %v179_v7 = vadd.s32 32, %v814_v2 }
  0x2c   : > { %v824_v8 = vadd.s32 %v817_v4, %v814_v2  ;;  %v180_v9 = vadd.s32 40, %v814_v2  ;;  %v181_v14 = vadd.s32 48, %v814_v2  ;;  %v182_v16 = vadd.s32 56, %v814_v2 }
  0x2d   : > { %v828_v10 = vadd.s32 %v817_v4, %v176_v3  ;;  %v830_v11 = vstv %s208_s3  ;;  %v833_v12 = vadd.s32 %v817_v4, %v177_v5  ;;  %v836_v13 = vadd.s32 %v817_v4, %v178_v6 }
  0x2e   : > { %v840_v15 = vadd.s32 %v817_v4, %v179_v7  ;;  %vm210_vm0 = vcmp.ge.s32.totalorder %v824_v8, %v830_v11  ;;  %v846_v17 = vadd.s32 %v817_v4, %v180_v9  ;;  %v850_v18 = vstv %s652_s5 }
  0x2f   : > { %vm211_vm1 = vcmp.ge.s32.totalorder %v828_v10, %v830_v11  ;;  %vm212_vm2 = vcmp.ge.s32.totalorder %v833_v12, %v830_v11  ;;  %vm228_vm3 = vcmp.lt.s32.totalorder %v824_v8, %v850_v18  ;;  %vm229_vm4 = vcmp.lt.s32.totalorder %v828_v10, %v850_v18 }
  0x30   : > { %vm230_vm5 = vcmp.lt.s32.totalorder %v833_v12, %v850_v18  ;;  %vm213_vm6 = vcmp.ge.s32.totalorder %v836_v13, %v830_v11  ;;  %vm231_vm7 = vcmp.lt.s32.totalorder %v836_v13, %v850_v18  ;;  %vm873_vm8 = vmand %vm210_vm0, %vm228_vm3  ;;  %v183_v23 = vadd.s32 64, %v814_v2 }
  0x31   : > { %v879_v24 = vadd.s32 %v817_v4, %v181_v14  ;;  %vm214_vm9 = vcmp.ge.s32.totalorder %v840_v15, %v830_v11  ;;  %vm232_vm10 = vcmp.lt.s32.totalorder %v840_v15, %v850_v18  ;;  %vm888_vm11 = vmand %vm211_vm1, %vm229_vm4  ;;  %v184_v27 = vadd.s32 72, %v814_v2 }
  0x32   : > { %v897_v28 = vadd.s32 %v817_v4, %v182_v16  ;;  %vm215_vm12 = vcmp.ge.s32.totalorder %v846_v17, %v830_v11  ;;  %vm907_vm13 = vmand %vm212_vm2, %vm230_vm5  ;;  %vm233_vm14 = vcmp.lt.s32.totalorder %v846_v17, %v850_v18  ;;  %v292_v31 = vsel %vm873_vm8, %v853_v19, 0.0  ;;  %v1094_v16 = vld [vmem:[%s811_s30 + $0x48] sm:$0xff] }
  0x33   : > { %vm918_vm15 = vmand %vm213_vm6, %vm231_vm7  ;;  %v293_v32 = vsel %vm888_vm11, %v864_v20, 0.0  ;;  %v294_v33 = vsel %vm907_vm13, %v867_v21, 0.0  ;;  %v185_v35 = vadd.s32 80, %v814_v2  ;;  %v186_v36 = vadd.s32 88, %v814_v2 }
  0x34   : > { %vm942_vm0 = vmand %vm214_vm9, %vm232_vm10  ;;  %v308_v38 = vadd.f32 %v293_v32, %v292_v31  ;;  %v947_v39 = vadd.s32 %v817_v4, %v183_v23  ;;  %vm216_vm1 = vcmp.ge.s32.totalorder %v879_v24, %v830_v11  ;;  %vm234_vm2 = vcmp.lt.s32.totalorder %v879_v24, %v850_v18 }
  0x35   : > { %v295_v40 = vsel %vm918_vm15, %v893_v26, 0.0  ;;  %v187_v42 = vadd.s32 96, %v814_v2  ;;  %v188_v43 = vadd.s32 104, %v814_v2  ;;  %vm967_vm3 = vmand %vm215_vm12, %vm233_vm14  ;;  %v972_v46 = vadd.s32 %v817_v4, %v184_v27 }
  0x36   : > { %v309_v45 = vadd.f32 %v308_v38, %v294_v33  ;;  %vm217_vm4 = vcmp.ge.s32.totalorder %v897_v28, %v830_v11  ;;  %vm235_vm5 = vcmp.lt.s32.totalorder %v897_v28, %v850_v18  ;;  %v296_v47 = vsel %vm942_vm0, %v932_v34, 0.0  ;;  %vm993_vm6 = vmand %vm216_vm1, %vm234_vm2 }
  0x37   : > { %v985_v49 = vadd.s32 %v817_v4, %v185_v35  ;;  %v988_v50 = vadd.s32 %v817_v4, %v186_v36  ;;  %v189_v53 = vadd.s32 112, %v814_v2  ;;  %vm218_vm7 = vcmp.ge.s32.totalorder %v947_v39, %v830_v11  ;;  %vm1015_vm9 = vmand %vm217_vm4, %vm235_vm5  ;;  %v1162_v35 = vld [vmem:[%s811_s30 + $0x50] sm:$0xff] }
  0x38   : > { %v310_v52 = vadd.f32 %v309_v45, %v295_v40  ;;  %vm236_vm8 = vcmp.lt.s32.totalorder %v947_v39, %v850_v18  ;;  %v297_v54 = vsel %vm967_vm3, %v957_v41, 0.0  ;;  %v190_v56 = vadd.s32 120, %v814_v2 }
  0x39   : > { %v1010_v57 = vadd.s32 %v817_v4, %v187_v42  ;;  %v1020_v60 = vstv %s911_s6  ;;  %v1023_v61 = vadd.s32 %v817_v4, %v188_v43  ;;  %vm219_vm10 = vcmp.ge.s32.totalorder %v972_v46, %v830_v11  ;;  %vm1047_vm15 = vmand %vm218_vm7, %vm236_vm8 }
  0x3a   : > { %v311_v59 = vadd.f32 %v310_v52, %v296_v47  ;;  %vm237_vm11 = vcmp.lt.s32.totalorder %v972_v46, %v850_v18  ;;  %v298_v62 = vsel %vm993_vm6, %v982_v48, 0.0  ;;  %vm220_vm12 = vcmp.ge.s32.totalorder %v985_v49, %v830_v11 }
  0x3b   : > { %vm221_vm13 = vcmp.ge.s32.totalorder %v988_v50, %v830_v11  ;;  %vm238_vm14 = vcmp.lt.s32.totalorder %v985_v49, %v850_v18  ;;  %vm239_vm0 = vcmp.lt.s32.totalorder %v988_v50, %v850_v18  ;;  %v299_v2 = vsel %vm1015_vm9, %v1006_v55, 0.0  ;;  %vm1068_vm3 = vmand %vm219_vm10, %vm237_vm11 }
  0x3c   : > { %v312_v1 = vadd.f32 %v311_v59, %v297_v54  ;;  %vm329_vm1 = vcmp.ge.s32.totalorder %v824_v8, %v850_v18  ;;  %vm347_vm2 = vcmp.lt.s32.totalorder %v824_v8, %v1020_v60  ;;  %v1063_v3 = vadd.s32 %v817_v4, %v189_v53  ;;  %vm1082_vm6 = vmand %vm220_vm12, %vm238_vm14  ;;  %v1235_v53 = vld [vmem:[%s811_s30 + $0x58] sm:$0xff] }
  0x3d   : > { %vm330_vm4 = vcmp.ge.s32.totalorder %v828_v10, %v850_v18  ;;  %vm348_vm5 = vcmp.lt.s32.totalorder %v828_v10, %v1020_v60  ;;  %v1077_v7 = vadd.s32 %v817_v4, %v190_v56  ;;  %v300_v14 = vsel %vm1047_vm15, %v1033_v63, 0.0  ;;  %vm1104_vm10 = vmand %vm221_vm13, %vm239_vm0 }
  0x3e   : > { %v313_v6 = vadd.f32 %v312_v1, %v298_v62  ;;  %vm331_vm7 = vcmp.ge.s32.totalorder %v833_v12, %v850_v18  ;;  %vm349_vm8 = vcmp.lt.s32.totalorder %v833_v12, %v1020_v60  ;;  %vm332_vm11 = vcmp.ge.s32.totalorder %v836_v13, %v850_v18  ;;  %vm363_vm14 = vmand %vm329_vm1, %vm347_vm2  ;;  %v1273_v62 = vld [vmem:[%s811_s30 + $0x60] sm:$0xff] }
  0x3f   : > { %vm350_vm12 = vcmp.lt.s32.totalorder %v836_v13, %v1020_v60  ;;  %vm333_vm15 = vcmp.ge.s32.totalorder %v840_v15, %v850_v18  ;;  %vm351_vm0 = vcmp.lt.s32.totalorder %v840_v15, %v1020_v60  ;;  %vm364_vm9 = vmand %vm330_vm4, %vm348_vm5  ;;  %v411_v23 = vsel %vm363_vm14, %v853_v19, 0.0 }
  0x40   : > { %v314_v22 = vadd.f32 %v313_v6, %v299_v2  ;;  %vm334_vm1 = vcmp.ge.s32.totalorder %v846_v17, %v850_v18  ;;  %vm352_vm2 = vcmp.lt.s32.totalorder %v846_v17, %v1020_v60  ;;  %vm1141_vm13 = vmand %vm331_vm7, %vm349_vm8  ;;  %v412_v29 = vsel %vm364_vm9, %v864_v20, 0.0  ;;  %v1527_v6 = vld [vmem:[%s811_s30 + $0x78] sm:$0xff] }
  0x41   : > { %vm240_vm4 = vcmp.lt.s32.totalorder %v1010_v57, %v850_v18  ;;  %v301_v30 = vsel %vm1068_vm3, %v1094_v16, 0.0  ;;  %vm1154_vm5 = vmand %vm332_vm11, %vm350_vm12  ;;  %v413_v32 = vsel %vm1141_vm13, %v867_v21, 0.0  ;;  %v427_v33 = vadd.f32 %v412_v29, %v411_v23 }
  0x42   : > { %v315_v25 = vadd.f32 %v314_v22, %v300_v14  ;;  %vm335_vm3 = vcmp.ge.s32.totalorder %v879_v24, %v850_v18  ;;  %vm353_vm8 = vcmp.lt.s32.totalorder %v879_v24, %v1020_v60  ;;  %vm1176_vm9 = vmand %vm333_vm15, %vm351_vm0  ;;  %v414_v37 = vsel %vm1154_vm5, %v893_v26, 0.0  ;;  %v1310_v14 = vld [vmem:[%s811_s30 + $0x68] sm:$0xff] }
  0x43   : > { %vm241_vm12 = vcmp.lt.s32.totalorder %v1023_v61, %v850_v18  ;;  %vm1193_vm14 = vmand %vm334_vm1, %vm352_vm2  ;;  %v428_v40 = vadd.f32 %v427_v33, %v413_v32  ;;  %v1198_v42 = vstv %s1060_s7  ;;  %vm1692_vm13 = vcmp.ge.s32.totalorder %v1010_v57, %v830_v11 }
  0x44   : > { %vm1206_vm15 = vmand %vm1692_vm13, %vm240_vm4  ;;  %v316_v44 = vadd.f32 %v315_v25, %v301_v30  ;;  %vm336_vm0 = vcmp.ge.s32.totalorder %v897_v28, %v850_v18  ;;  %vm354_vm1 = vcmp.lt.s32.totalorder %v897_v28, %v1020_v60  ;;  %v415_v45 = vsel %vm1176_vm9, %v932_v34, 0.0 }
  0x45   : > { %v302_v47 = vsel %vm1082_vm6, %v1162_v35, 0.0  ;;  %vm337_vm2 = vcmp.ge.s32.totalorder %v947_v39, %v850_v18  ;;  %vm355_vm4 = vcmp.lt.s32.totalorder %v947_v39, %v1020_v60  ;;  %vm1230_vm5 = vmand %vm335_vm3, %vm353_vm8  ;;  %v429_v52 = vadd.f32 %v428_v40, %v414_v37 }
  0x46   : > { %vm242_vm6 = vcmp.lt.s32.totalorder %v1063_v3, %v850_v18  ;;  %vm1697_vm9 = vcmp.ge.s32.totalorder %v1023_v61, %v830_v11  ;;  %vm338_vm3 = vcmp.ge.s32.totalorder %v972_v46, %v850_v18  ;;  %vm356_vm8 = vcmp.lt.s32.totalorder %v972_v46, %v1020_v60  ;;  %vm1268_vm7 = vmand %vm336_vm0, %vm354_vm1 }
  0x47   : > { %vm1245_vm13 = vmand %vm1697_vm9, %vm241_vm12  ;;  %v416_v56 = vsel %vm1193_vm14, %v957_v41, 0.0  ;;  %vm339_vm12 = vcmp.ge.s32.totalorder %v985_v49, %v850_v18  ;;  %vm357_vm9 = vcmp.lt.s32.totalorder %v985_v49, %v1020_v60  ;;  %v430_v59 = vadd.f32 %v429_v52, %v415_v45  ;;  %v1459_v52 = vld [vmem:[%s811_s30 + $0x70] sm:$0xff] }
  0x48   : > { %v317_v0 = vadd.f32 %v316_v44, %v302_v47  ;;  %vm358_vm11 = vcmp.lt.s32.totalorder %v988_v50, %v1020_v60  ;;  %vm1285_vm0 = vmand %vm337_vm2, %vm355_vm4  ;;  %v417_v2 = vsel %vm1230_vm5, %v982_v48, 0.0  ;;  %v303_v5 = vsel %vm1104_vm10, %v1235_v53, 0.0 }
  0x49   : > { %vm359_vm14 = vcmp.lt.s32.totalorder %v1010_v57, %v1020_v60  ;;  %vm1305_vm2 = vmand %vm338_vm3, %vm356_vm8  ;;  %v431_v9 = vadd.f32 %v430_v59, %v416_v56  ;;  %vm1706_vm10 = vcmp.ge.s32.totalorder %v1063_v3, %v830_v11  ;;  %vm342_vm5 = vcmp.ge.s32.totalorder %v1023_v61, %v850_v18 }
  0x4a   : > { %vm1318_vm4 = vmand %vm1706_vm10, %vm242_vm6  ;;  %vm360_vm8 = vcmp.lt.s32.totalorder %v1023_v61, %v1020_v60  ;;  %v418_v23 = vsel %vm1268_vm7, %v1006_v55, 0.0  ;;  %v304_v25 = vsel %vm1206_vm15, %v1273_v62, 0.0  ;;  %vm448_vm7 = vcmp.ge.s32.totalorder %v824_v8, %v1020_v60 }
  0x4b   : > { %vm1334_vm1 = vmand %vm339_vm12, %vm357_vm9  ;;  %vm1711_vm12 = vcmp.ge.s32.totalorder %v988_v50, %v850_v18  ;;  %v432_v29 = vadd.f32 %v431_v9, %v417_v2  ;;  %vm466_vm15 = vcmp.lt.s32.totalorder %v824_v8, %v1198_v42  ;;  %v318_v30 = vadd.f32 %v317_v0, %v303_v5 }
  0x4c   : > { %vm1352_vm9 = vmand %vm1711_vm12, %vm358_vm11  ;;  %vm1714_vm10 = vcmp.ge.s32.totalorder %v1010_v57, %v850_v18  ;;  %v419_v32 = vsel %vm1285_vm0, %v1033_v63, 0.0  ;;  %vm467_vm12 = vcmp.lt.s32.totalorder %v828_v10, %v1198_v42  ;;  %v305_v33 = vsel %vm1245_vm13, %v1310_v14, 0.0 }
  0x4d   : > { %vm1366_vm6 = vmand %vm1714_vm10, %vm359_vm14  ;;  %v433_v37 = vadd.f32 %v432_v29, %v418_v23  ;;  %vm468_vm10 = vcmp.lt.s32.totalorder %v833_v12, %v1198_v42  ;;  %vm1719_vm13 = vcmp.lt.s32.totalorder %v1077_v7, %v850_v18  ;;  %vm1720_vm3 = vcmp.ge.s32.totalorder %v1077_v7, %v830_v11 }
  0x4e   : > { %vm1386_vm14 = vmand %vm342_vm5, %vm360_vm8  ;;  %v420_v40 = vsel %vm1305_vm2, %v1094_v16, 0.0  ;;  %vm469_vm0 = vcmp.lt.s32.totalorder %v836_v13, %v1198_v42  ;;  %vm1723_vm8 = vcmp.ge.s32.totalorder %v828_v10, %v1020_v60  ;;  %v319_v44 = vadd.f32 %v318_v30, %v304_v25 }
  0x4f   : > { %vm1400_vm11 = vmand %vm1720_vm3, %vm1719_vm13  ;;  %v434_v11 = vadd.f32 %v433_v37, %v419_v32  ;;  %vm470_vm13 = vcmp.lt.s32.totalorder %v840_v15, %v1198_v42  ;;  %v421_v8 = vsel %vm1334_vm1, %v1162_v35, 0.0  ;;  %vm1727_vm1 = vcmp.ge.s32.totalorder %v836_v13, %v1020_v60 }
  0x50   : > { %vm482_vm3 = vmand %vm448_vm7, %vm466_vm15  ;;  %vm471_vm7 = vcmp.lt.s32.totalorder %v846_v17, %v1198_v42  ;;  %vm1724_vm15 = vcmp.ge.s32.totalorder %v833_v12, %v1020_v60  ;;  %v320_v58 = vadd.f32 %v319_v44, %v305_v33  ;;  %v306_v0 = vsel %vm1318_vm4, %v1459_v52, 0.0 }
  0x51   : > { %vm483_vm5 = vmand %vm1723_vm8, %vm467_vm12  ;;  %v530_v43 = vsel %vm482_vm3, %v853_v19, 0.0  ;;  %vm361_vm12 = vcmp.lt.s32.totalorder %v1063_v3, %v1020_v60  ;;  %v435_v19 = vadd.f32 %v434_v11, %v420_v40  ;;  %vm1741_vm4 = vcmp.ge.s32.totalorder %v1077_v7, %v850_v18 }
  0x52   : > { %vm1441_vm2 = vmand %vm1724_vm15, %vm468_vm10  ;;  %v531_v10 = vsel %vm483_vm5, %v864_v20, 0.0  ;;  %v422_v20 = vsel %vm1352_vm9, %v1235_v53, 0.0  ;;  %vm454_vm10 = vcmp.ge.s32.totalorder %v879_v24, %v1020_v60  ;;  %vm1730_vm5 = vcmp.ge.s32.totalorder %v840_v15, %v1020_v60 }
  0x53   : > { %vm1451_vm8 = vmand %vm1727_vm1, %vm469_vm0  ;;  %v532_v12 = vsel %vm1441_vm2, %v867_v21, 0.0  ;;  %v546_v51 = vadd.f32 %v531_v10, %v530_v43  ;;  %vm472_vm0 = vcmp.lt.s32.totalorder %v879_v24, %v1198_v42  ;;  %vm362_vm9 = vcmp.lt.s32.totalorder %v1077_v7, %v1020_v60 }
  0x54   : > { %vm1474_vm3 = vmand %vm1730_vm5, %vm470_vm13  ;;  %v533_v21 = vsel %vm1451_vm8, %v893_v26, 0.0  ;;  %v436_v54 = vadd.f32 %v435_v19, %v421_v8  ;;  %vm455_vm2 = vcmp.ge.s32.totalorder %v897_v28, %v1020_v60  ;;  %vm1733_vm13 = vcmp.ge.s32.totalorder %v846_v17, %v1020_v60 }
  0x55   : > { %vm1491_vm15 = vmand %vm1733_vm13, %vm471_vm7  ;;  %v547_v56 = vadd.f32 %v546_v51, %v532_v12  ;;  %vm1736_vm1 = vcmp.ge.s32.totalorder %v1063_v3, %v850_v18  ;;  %v423_v17 = vsel %vm1366_vm6, %v1273_v62, 0.0  ;;  %vm473_vm7 = vcmp.lt.s32.totalorder %v897_v28, %v1198_v42 }
  0x56   : > { %vm1501_vm8 = vmand %vm1736_vm1, %vm361_vm12  ;;  %v534_v59 = vsel %vm1474_vm3, %v932_v34, 0.0  ;;  %v437_v1 = vadd.f32 %v436_v54, %v422_v20  ;;  %v424_v24 = vsel %vm1386_vm14, %v1310_v14, 0.0  ;;  %v535_v9 = vsel %vm1491_vm15, %v957_v41, 0.0 }
  0x57   : > { %vm1522_vm12 = vmand %vm454_vm10, %vm472_vm0  ;;  %v548_v5 = vadd.f32 %v547_v56, %v533_v21  ;;  %vm456_vm10 = vcmp.ge.s32.totalorder %v947_v39, %v1020_v60  ;;  %vm474_vm0 = vcmp.lt.s32.totalorder %v947_v39, %v1198_v42  ;;  %vm457_vm5 = vcmp.ge.s32.totalorder %v972_v46, %v1020_v60 }
  0x58   : > { %vm1535_vm6 = vmand %vm1741_vm4, %vm362_vm9  ;;  %v438_v4 = vadd.f32 %v437_v1, %v423_v17  ;;  %v321_v23 = vadd.f32 %v320_v58, %v306_v0  ;;  %v425_v39 = vsel %vm1501_vm8, %v1459_v52, 0.0  ;;  %vm475_vm14 = vcmp.lt.s32.totalorder %v972_v46, %v1198_v42  ;;  %v571_v0 = vld [vmem:[%s806_s27] sm:$0x7] }
  0x59   : > { %vm1554_vm3 = vmand %vm455_vm2, %vm473_vm7  ;;  %v549_v22 = vadd.f32 %v548_v5, %v534_v59  ;;  %v536_v41 = vsel %vm1522_vm12, %v982_v48, 0.0  ;;  %v307_v28 = vsel %vm1400_vm11, %v1527_v6, 0.0  ;;  %v426_v30 = vsel %vm1535_vm6, %v1527_v6, 0.0 }
  0x5a   : > { %v439_v25 = vadd.f32 %v438_v4, %v424_v24  ;;  %vm1569_vm9 = vmand %vm456_vm10, %vm474_vm0  ;;  %vm458_vm2 = vcmp.ge.s32.totalorder %v985_v49, %v1020_v60  ;;  %vm476_vm13 = vcmp.lt.s32.totalorder %v985_v49, %v1198_v42  ;;  %v537_v48 = vsel %vm1554_vm3, %v1006_v55, 0.0 }
  0x5b   : > { %v550_v29 = vadd.f32 %v549_v22, %v535_v9  ;;  %vm1586_vm11 = vmand %vm457_vm5, %vm475_vm14  ;;  %v322_v36 = vadd.f32 %v321_v23, %v307_v28  ;;  %vm459_vm15 = vcmp.ge.s32.totalorder %v988_v50, %v1020_v60  ;;  %vm477_vm1 = vcmp.lt.s32.totalorder %v988_v50, %v1198_v42 }
  0x5c   : > { %v440_v31 = vadd.f32 %v439_v25, %v425_v39  ;;  %v538_v49 = vsel %vm1569_vm9, %v1033_v63, 0.0  ;;  %vm1597_vm8 = vmand %vm458_vm2, %vm476_vm13  ;;  %vm460_vm7 = vcmp.ge.s32.totalorder %v1010_v57, %v1020_v60  ;;  %vm478_vm12 = vcmp.lt.s32.totalorder %v1010_v57, %v1198_v42 }
  0x5d   : > { %v551_v33 = vadd.f32 %v550_v29, %v536_v41  ;;  %v539_v50 = vsel %vm1586_vm11, %v1094_v16, 0.0  ;;  %vm461_vm4 = vcmp.ge.s32.totalorder %v1023_v61, %v1020_v60  ;;  %vm1610_vm6 = vmand %vm459_vm15, %vm477_vm1  ;;  %v323_v40 = vrot.slane %v322_v36, 4 }
  0x5e   : > { %v441_v55 = vadd.f32 %v440_v31, %v426_v30  ;;  %vm479_vm10 = vcmp.lt.s32.totalorder %v1023_v61, %v1198_v42  ;;  %v540_v57 = vsel %vm1597_vm8, %v1162_v35, 0.0  ;;  %vm1619_vm0 = vmand %vm460_vm7, %vm478_vm12  ;;  %vm462_vm5 = vcmp.ge.s32.totalorder %v1063_v3, %v1020_v60 }
  0x5f   : > { %v552_v46 = vadd.f32 %v551_v33, %v537_v48  ;;  %vm480_vm3 = vcmp.lt.s32.totalorder %v1063_v3, %v1198_v42  ;;  %v541_v44 = vsel %vm1610_vm6, %v1235_v53, 0.0  ;;  %vm463_vm14 = vcmp.ge.s32.totalorder %v1077_v7, %v1020_v60  ;;  %vm495_vm9 = vmand %vm461_vm4, %vm479_vm10 }
  0x60   : > { %v442_v11 = vrot.slane %v441_v55, 4  ;;  %v324_v35 = vadd.f32 %v323_v40, %v322_v36  ;;  %vm481_vm2 = vcmp.lt.s32.totalorder %v1077_v7, %v1198_v42  ;;  %v542_v45 = vsel %vm1619_vm0, %v1273_v62, 0.0  ;;  %vm496_vm13 = vmand %vm462_vm5, %vm480_vm3 }
  0x61   : > { %v553_v38 = vadd.f32 %v552_v46, %v538_v49  ;;  %v543_v10 = vsel %vm495_vm9, %v1310_v14, 0.0  ;;  %vm497_vm11 = vmand %vm463_vm14, %vm481_vm2  ;;  %v544_v60 = vsel %vm496_vm13, %v1459_v52, 0.0  ;;  %vm567_vm15 = vcmask 1040384  }
  0x62   : > { %v443_v8 = vadd.f32 %v442_v11, %v441_v55  ;;  %v325_v19 = vrot.slane %v324_v35, 2  ;;  %v545_v51 = vsel %vm497_vm11, %v1527_v6, 0.0  ;;  %vm569_vm1 = vcmask 1041408  }
  0x63   : > { %v554_v16 = vadd.f32 %v553_v38, %v539_v50 }
  0x64   : > { %v444_v47 = vrot.slane %v443_v8, 2  ;;  %v326_v13 = vadd.f32 %v325_v19, %v324_v35 }
  0x65   : > { %v555_v61 = vadd.f32 %v554_v16, %v540_v57 }
  0x66   : > { %v445_v7 = vadd.f32 %v444_v47, %v443_v8  ;;  %v327_v62 = vrot.slane %v326_v13, 1 }
  0x67   : > { %v556_v3 = vadd.f32 %v555_v61, %v541_v44 }
  0x68   : > { %v446_v54 = vrot.slane %v445_v7, 1  ;;  %v328_v56 = vadd.f32 %v327_v62, %v326_v13 }
  0x69   : > { %v557_v53 = vadd.f32 %v556_v3, %v542_v45 }
  0x6a   : > { %v447_v58 = vadd.f32 %v446_v54, %v445_v7 }
  0x6b   : > { %v558_v12 = vadd.f32 %v557_v53, %v543_v10 }
  0x6c   : > { %v568_v52 = vsel %vm567_vm15, %v328_v56, %v447_v58 }
  0x6d   : > { %v559_v20 = vadd.f32 %v558_v12, %v544_v60 }
  0x6f   : > { %v560_v42 = vadd.f32 %v559_v20, %v545_v51 }
  0x71   : > { %v561_v21 = vrot.slane %v560_v42, 4 }
  0x73   : > { %v562_v15 = vadd.f32 %v561_v21, %v560_v42 }
  0x75   : > { %v563_v14 = vrot.slane %v562_v15, 2 }
  0x77   : > { %v564_v26 = vadd.f32 %v563_v14, %v562_v15 }
  0x79   : > { %v565_v17 = vrot.slane %v564_v26, 1 }
  0x7b   : > { %v566_v59 = vadd.f32 %v565_v17, %v564_v26 }
  0x7d   : > { %v570_v1 = vsel %vm569_vm1, %v568_v52, %v566_v59 }
  0x7e   : > { %v572_v2 = vadd.f32 %v571_v0, %v570_v1 }
  0x80   : > { %573 = vst [vmem:[%s806_s27] sm:$0x7] %v572_v2 }
  0x81 PF: > { %s18_s17 = sadd.s32 1, %s751_s17   ;;  %s1756_s14 = smov %s743_s16 }
  0x82   : > { %p15_p13 = scmp.ge.s32.totalorder %s18_s17, 6   ;;  %s1757_s15 = smov %s747_s0 }
  0x83   : > { %s1758_s16 = smov %s1761_s18  ;;  %s1759_s0 = smov %s1765_s19 }
  0x84   :  { %17 = sbr.rel (!%p15_p13) target bundleno = 18 (0x12), region = 58 }

// kernel: vn_update.3
= control target key start
LH: loop header
LB: loop body
LE: loop exit
PB: predicated region body
PF: predicated region fallthrough
CT: control target
= control target key end

     0   :  { %s703_s0 = inlined_call_operand.vmem [shape: s32[4], index: 0, kind: input, shape index: {}]   ;;  %s704_s1 = inlined_call_operand.vmem [shape: f32[512,128], index: 1, kind: input, shape index: {}]   ;;  %s705_s2 = inlined_call_operand.vmem [shape: f32[3,128], index: 2, kind: input, shape index: {}]   ;;  %s706_s3 = inlined_call_operand.vmem [shape: f32[512,128], index: 3, kind: output, shape index: {}]  }
   0x1   :  { %s8_s14 = sshll.u32 %s703_s0, 4  ;;  %s9_s14 = int_to_ptr.vmem [resolvable:$true] %s8_s14 }
   0x2   :  { %s466_s15 = scalar_lea.vmem %s9_s14, 16  ;;  %p471_p1 = scmp.lt.s32.totalorder %s9_s14, %s9_s14 }
   0x3   :  { %p467_p0 = scmp.ne.s32.totalorder %s9_s14, %s466_s15  ;;  %p472_p2 = scmp.lt.s32.totalorder %s466_s15, %s466_s15 }
   0x5   :  { %p473_p3 = por %p472_p2, %p471_p1 }
   0x7   :  { %p474_p4 = pnand %p473_p3, %p467_p0 }
   0x9   :  { %477 = shalt.err (!%p474_p4)  }
   0xa   :  { %s488_s16 = smov [#allocation3]  }
   0xb   :  { %11 = dma.vmem_to_smem %s9_s14, 16, %s488_s16, [#allocation2] }
   0xc   :  { %482 = dma.done.wait [#allocation2], 16 }
   0xd   :  { %483 = vsyncadd [#allocation2], 4294967280 }
   0xe   :  { %13 = sfence }
   0xf   :  { %s512_s17 = smov 0  }
  0x10 LB: > { %s440_s0 = sadd.s32 4294967295, %s486_s17   ;;  %p444_p5 = scmp.ge.s32.totalorder %s486_s17, 1  ;;  %s486_s17 = sphi %s512_s17, %s19_s17  }
  0x11   : > { %p120_p6 = scmp.lt.s32.totalorder %s486_s17, 5 }
  0x13   : > { %p121_p7 = pnand %p444_p5, %p120_p6 }
  0x14   : > { %s445_s18 = sshll.u32 (!%p121_p7), %s440_s0, 4  ;;  %s449_s19 = sshll.u32 (!%p121_p7), %s440_s0, 7 }
  0x15   : > { %124 = sbr.rel (%p121_p7) target bundleno = 62 (0x3e), region = 28  ;;  %p143_p8 = scmp.lt.s32.totalorder (!%p121_p7), %s445_s18, 63 }
  0x16   : > { %s451_s20 = sld [smem:[#allocation3 + $0x1]] (!%p121_p7) }
  0x17   : > { %s453_s21 = sld [smem:[#allocation3 + $0x2]] (!%p121_p7) }
  0x1a   : > { %v155_v0 = vlaneseq  ;;  %v520_v1 = vstv %s449_s19  ;;  %s708_s18 = smov (!%p143_p8, %s445_s18), 63  ;;  %v544_v11 = vld [vmem:[%s705_s2] ss:$0 sm:$0xff]  ;;  %v549_v12 = vld [vmem:[%s705_s2 + $0x1] ss:$0 sm:$0xff] }
  0x1b   : > { %s446_s22 = sshll.u32 %s708_s18, 3  ;;  %v560_v18 = vld [vmem:[%s705_s2 + $0x2] ss:$0 sm:$0xff] }
  0x1c   : > { %v522_v2 = vshrl.u32 %v155_v0, 7  ;;  %s539_s25 = scalar_lea.vmem %s704_s1, %s446_s22  ;;  %v555_v17 = vstv %s451_s20  ;;  %s582_s7 = scalar_lea.vmem %s706_s3, %s446_s22 }
  0x1d   : > { %v189_v22 = vld [vmem:[%s539_s25] sm:$0xff]  ;;  %v567_v23 = vstv %s453_s21  ;;  %v190_v24 = vld [vmem:[%s539_s25 + $0x8] sm:$0xff]  ;;  %v191_v27 = vld [vmem:[%s539_s25 + $0x10] sm:$0xff] }
  0x1e   : > { %v173_v3 = vadd.s32 %v520_v1, %v522_v2  ;;  %v157_v4 = vadd.s32 8, %v522_v2  ;;  %v158_v5 = vadd.s32 16, %v522_v2  ;;  %v159_v6 = vadd.s32 24, %v522_v2  ;;  %v192_v34 = vld [vmem:[%s539_s25 + $0x18] sm:$0xff]  ;;  %v193_v37 = vld [vmem:[%s539_s25 + $0x20] sm:$0xff]  ;;  %v194_v40 = vld [vmem:[%s539_s25 + $0x28] sm:$0xff] }
  0x1f   : > { %v160_v7 = vadd.s32 32, %v522_v2  ;;  %v161_v8 = vadd.s32 40, %v522_v2  ;;  %v162_v9 = vadd.s32 48, %v522_v2  ;;  %v163_v10 = vadd.s32 56, %v522_v2  ;;  %v195_v46 = vld [vmem:[%s539_s25 + $0x30] sm:$0xff]  ;;  %v196_v56 = vld [vmem:[%s539_s25 + $0x38] sm:$0xff] }
  0x20   : > { %v174_v13 = vadd.s32 %v520_v1, %v157_v4  ;;  %v175_v14 = vadd.s32 %v520_v1, %v158_v5  ;;  %v176_v15 = vadd.s32 %v520_v1, %v159_v6  ;;  %v164_v16 = vadd.s32 64, %v522_v2  ;;  %v197_v57 = vld [vmem:[%s539_s25 + $0x40] sm:$0xff]  ;;  %v198_v5 = vld [vmem:[%s539_s25 + $0x48] sm:$0xff] }
  0x21   : > { %v177_v19 = vadd.s32 %v520_v1, %v160_v7  ;;  %v178_v20 = vadd.s32 %v520_v1, %v161_v8  ;;  %v179_v21 = vadd.s32 %v520_v1, %v162_v9  ;;  %vm212_vm0 = vcmp.ge.s32.totalorder %v173_v3, %v555_v17  ;;  %v199_v7 = vld [vmem:[%s539_s25 + $0x50] sm:$0xff]  ;;  %v200_v8 = vld [vmem:[%s539_s25 + $0x58] sm:$0xff] }
  0x22   : > { %vm213_vm1 = vcmp.ge.s32.totalorder %v174_v13, %v555_v17  ;;  %vm214_vm2 = vcmp.ge.s32.totalorder %v175_v14, %v555_v17  ;;  %v265_v25 = vsel %vm212_vm0, %v549_v12, %v544_v11  ;;  %vm283_vm3 = vcmp.ge.s32.totalorder %v173_v3, %v567_v23 }
  0x23   : > { %v266_v26 = vsel %vm213_vm1, %v549_v12, %v544_v11  ;;  %vm284_vm4 = vcmp.ge.s32.totalorder %v174_v13, %v567_v23  ;;  %v336_v28 = vsel %vm283_vm3, %v560_v18, %v265_v25  ;;  %v267_v30 = vsel %vm214_vm2, %v549_v12, %v544_v11 }
  0x24   : > { %v337_v29 = vsel %vm284_vm4, %v560_v18, %v266_v26  ;;  %vm285_vm5 = vcmp.ge.s32.totalorder %v175_v14, %v567_v23  ;;  %v352_v31 = vadd.f32 %v336_v28, %v189_v22  ;;  %vm215_vm6 = vcmp.ge.s32.totalorder %v176_v15, %v555_v17 }
  0x25   : > { %v353_v32 = vadd.f32 %v337_v29, %v190_v24  ;;  %v338_v33 = vsel %vm285_vm5, %v560_v18, %v267_v30  ;;  %v268_v36 = vsel %vm215_vm6, %v549_v12, %v544_v11  ;;  %vm286_vm7 = vcmp.ge.s32.totalorder %v176_v15, %v567_v23  ;;  %v201_v29 = vld [vmem:[%s539_s25 + $0x60] sm:$0xff] }
  0x26   : > { %v354_v35 = vadd.f32 %v338_v33, %v191_v27  ;;  %vm216_vm8 = vcmp.ge.s32.totalorder %v177_v19, %v555_v17  ;;  %368 = vst [vmem:[%s582_s7] sm:$0xff] %v352_v31  ;;  %v339_v38 = vsel %vm286_vm7, %v560_v18, %v268_v36  ;;  %vm287_vm9 = vcmp.ge.s32.totalorder %v177_v19, %v567_v23 }
  0x27   : > { %369 = vst [vmem:[%s582_s7 + $0x8] sm:$0xff] %v353_v32  ;;  %v269_v39 = vsel %vm216_vm8, %v549_v12, %v544_v11  ;;  %vm217_vm10 = vcmp.ge.s32.totalorder %v178_v20, %v555_v17  ;;  %v355_v41 = vadd.f32 %v339_v38, %v192_v34  ;;  %vm288_vm11 = vcmp.ge.s32.totalorder %v178_v20, %v567_v23  ;;  %v202_v32 = vld [vmem:[%s539_s25 + $0x68] sm:$0xff]  ;;  %v204_v38 = vld [vmem:[%s539_s25 + $0x78] sm:$0xff] }
  0x28   : > { %370 = vst [vmem:[%s582_s7 + $0x10] sm:$0xff] %v354_v35  ;;  %v340_v42 = vsel %vm287_vm9, %v560_v18, %v269_v39  ;;  %v270_v43 = vsel %vm217_vm10, %v549_v12, %v544_v11  ;;  %vm218_vm12 = vcmp.ge.s32.totalorder %v179_v21, %v555_v17  ;;  %vm289_vm13 = vcmp.ge.s32.totalorder %v179_v21, %v567_v23 }
  0x29   : > { %v356_v44 = vadd.f32 %v340_v42, %v193_v37  ;;  %v341_v45 = vsel %vm288_vm11, %v560_v18, %v270_v43  ;;  %371 = vst [vmem:[%s582_s7 + $0x18] sm:$0xff] %v355_v41  ;;  %v271_v48 = vsel %vm218_vm12, %v549_v12, %v544_v11  ;;  %v180_v49 = vadd.s32 %v520_v1, %v163_v10 }
  0x2a   : > { %v357_v47 = vadd.f32 %v341_v45, %v194_v40  ;;  %v181_v50 = vadd.s32 %v520_v1, %v164_v16  ;;  %v342_v51 = vsel %vm289_vm13, %v560_v18, %v271_v48  ;;  %v165_v52 = vadd.s32 72, %v522_v2 }
  0x2b   : > { %372 = vst [vmem:[%s582_s7 + $0x20] sm:$0xff] %v356_v44  ;;  %v166_v53 = vadd.s32 80, %v522_v2  ;;  %v167_v54 = vadd.s32 88, %v522_v2  ;;  %v358_v55 = vadd.f32 %v342_v51, %v195_v46  ;;  %vm219_vm14 = vcmp.ge.s32.totalorder %v180_v49, %v555_v17 }
  0x2c   : > { %373 = vst [vmem:[%s582_s7 + $0x28] sm:$0xff] %v357_v47  ;;  %vm290_vm15 = vcmp.ge.s32.totalorder %v180_v49, %v567_v23  ;;  %vm220_vm0 = vcmp.ge.s32.totalorder %v181_v50, %v555_v17  ;;  %v272_v58 = vsel %vm219_vm14, %v549_v12, %v544_v11  ;;  %vm291_vm1 = vcmp.ge.s32.totalorder %v181_v50, %v567_v23 }
  0x2d   : > { %v273_v59 = vsel %vm220_vm0, %v549_v12, %v544_v11  ;;  %v182_v60 = vadd.s32 %v520_v1, %v165_v52  ;;  %374 = vst [vmem:[%s582_s7 + $0x30] sm:$0xff] %v358_v55  ;;  %v343_v61 = vsel %vm290_vm15, %v560_v18, %v272_v58  ;;  %v183_v63 = vadd.s32 %v520_v1, %v166_v53 }
  0x2e   : > { %v344_v62 = vsel %vm291_vm1, %v560_v18, %v273_v59  ;;  %v184_v0 = vadd.s32 %v520_v1, %v167_v54  ;;  %v359_v3 = vadd.f32 %v343_v61, %v196_v56  ;;  %v168_v19 = vadd.s32 96, %v522_v2 }
  0x2f   : > { %v360_v4 = vadd.f32 %v344_v62, %v197_v57  ;;  %vm221_vm2 = vcmp.ge.s32.totalorder %v182_v60, %v555_v17  ;;  %vm292_vm3 = vcmp.ge.s32.totalorder %v182_v60, %v567_v23  ;;  %vm222_vm4 = vcmp.ge.s32.totalorder %v183_v63, %v555_v17 }
  0x30   : > { %v274_v6 = vsel %vm221_vm2, %v549_v12, %v544_v11  ;;  %vm293_vm5 = vcmp.ge.s32.totalorder %v183_v63, %v567_v23  ;;  %vm223_vm6 = vcmp.ge.s32.totalorder %v184_v0, %v555_v17  ;;  %375 = vst [vmem:[%s582_s7 + $0x38] sm:$0xff] %v359_v3  ;;  %v275_v10 = vsel %vm222_vm4, %v549_v12, %v544_v11 }
  0x31   : > { %376 = vst [vmem:[%s582_s7 + $0x40] sm:$0xff] %v360_v4  ;;  %v345_v9 = vsel %vm292_vm3, %v560_v18, %v274_v6  ;;  %v276_v13 = vsel %vm223_vm6, %v549_v12, %v544_v11  ;;  %vm294_vm7 = vcmp.ge.s32.totalorder %v184_v0, %v567_v23  ;;  %v346_v15 = vsel %vm293_vm5, %v560_v18, %v275_v10 }
  0x32   : > { %v361_v14 = vadd.f32 %v345_v9, %v198_v5  ;;  %v347_v16 = vsel %vm294_vm7, %v560_v18, %v276_v13  ;;  %v362_v20 = vadd.f32 %v346_v15, %v199_v7  ;;  %v169_v22 = vadd.s32 104, %v522_v2 }
  0x33   : > { %v363_v21 = vadd.f32 %v347_v16, %v200_v8  ;;  %v170_v24 = vadd.s32 112, %v522_v2  ;;  %v185_v25 = vadd.s32 %v520_v1, %v168_v19  ;;  %v171_v26 = vadd.s32 120, %v522_v2  ;;  %v203_v2 = vld [vmem:[%s539_s25 + $0x70] sm:$0xff] }
  0x34   : > { %377 = vst [vmem:[%s582_s7 + $0x48] sm:$0xff] %v361_v14  ;;  %378 = vst [vmem:[%s582_s7 + $0x50] sm:$0xff] %v362_v20  ;;  %v186_v27 = vadd.s32 %v520_v1, %v169_v22 }
  0x35   : > { %379 = vst [vmem:[%s582_s7 + $0x58] sm:$0xff] %v363_v21  ;;  %v187_v28 = vadd.s32 %v520_v1, %v170_v24  ;;  %vm224_vm8 = vcmp.ge.s32.totalorder %v185_v25, %v555_v17  ;;  %vm295_vm9 = vcmp.ge.s32.totalorder %v185_v25, %v567_v23  ;;  %v188_v30 = vadd.s32 %v520_v1, %v171_v26 }
  0x36   : > { %v277_v31 = vsel %vm224_vm8, %v549_v12, %v544_v11  ;;  %vm225_vm10 = vcmp.ge.s32.totalorder %v186_v27, %v555_v17  ;;  %vm296_vm11 = vcmp.ge.s32.totalorder %v186_v27, %v567_v23 }
  0x37   : > { %vm226_vm12 = vcmp.ge.s32.totalorder %v187_v28, %v555_v17  ;;  %v348_v33 = vsel %vm295_vm9, %v560_v18, %v277_v31  ;;  %v278_v34 = vsel %vm225_vm10, %v549_v12, %v544_v11  ;;  %vm297_vm13 = vcmp.ge.s32.totalorder %v187_v28, %v567_v23 }
  0x38   : > { %v279_v1 = vsel %vm226_vm12, %v549_v12, %v544_v11  ;;  %v364_v35 = vadd.f32 %v348_v33, %v201_v29  ;;  %v349_v36 = vsel %vm296_vm11, %v560_v18, %v278_v34  ;;  %vm227_vm14 = vcmp.ge.s32.totalorder %v188_v30, %v555_v17 }
  0x39   : > { %v350_v37 = vsel %vm297_vm13, %v560_v18, %v279_v1  ;;  %v365_v39 = vadd.f32 %v349_v36, %v202_v32  ;;  %v280_v41 = vsel %vm227_vm14, %v549_v12, %v544_v11  ;;  %vm298_vm15 = vcmp.ge.s32.totalorder %v188_v30, %v567_v23 }
  0x3a   : > { %v366_v40 = vadd.f32 %v350_v37, %v203_v2  ;;  %380 = vst [vmem:[%s582_s7 + $0x60] sm:$0xff] %v364_v35  ;;  %v351_v42 = vsel %vm298_vm15, %v560_v18, %v280_v41 }
  0x3b   : > { %381 = vst [vmem:[%s582_s7 + $0x68] sm:$0xff] %v365_v39  ;;  %v367_v43 = vadd.f32 %v351_v42, %v204_v38 }
  0x3c   : > { %382 = vst [vmem:[%s582_s7 + $0x70] sm:$0xff] %v366_v40 }
  0x3d   : > { %383 = vst [vmem:[%s582_s7 + $0x78] sm:$0xff] %v367_v43 }
  0x3e PF: > { %s19_s17 = sadd.s32 1, %s486_s17  }
  0x3f   : > { %p16_p9 = scmp.ge.s32.totalorder %s19_s17, 6  }
  0x41   :  { %18 = sbr.rel (!%p16_p9) target bundleno = 16 (0x10), region = 58 }

</bundles_post_ra>
